<compile_context>
chip_gen: v7x
topology: tpu7x:2x2x1
jax: 0.10.0
libtpu: 0.0.40
codegen_flags: <defaults>
</compile_context>

<pallas_src>
import jax
import jax.numpy as jnp
from jax import lax
from jax.experimental import pallas as pl
from jax.experimental.pallas import tpu as pltpu

_OUT_PAD = 128  # lane-dense output width (true output width is 2)


def _make_kernel(s_total, ts, compute_dtype):
    """Build the kernel for a given total sequence length / sequence tile."""
    needs_mask = (s_total % ts) != 0
    # Chunk size for the sequence sum: bounds the f32 widen to (tb, ch, F)
    # instead of materializing a full (tb, ts, F) f32 temporary.
    if ts % 8 != 0:
        ch = 1        # ragged whole-sequence tile: row at a time (VPU-cheap)
    elif ts % 32 == 0:
        ch = 32
    else:
        ch = 8
    n_chunks = ts // ch
    inv_s = 1.0 / float(s_total)

    def kernel(x_ref, w1_ref, b1_ref, w2_ref, b2_ref, o_ref, acc_ref):
        k = pl.program_id(1)

        @pl.when(k == 0)
        def _init():
            acc_ref[...] = jnp.zeros_like(acc_ref)

        tb, _, f = x_ref.shape
        if needs_mask:
            base = k * ts
            iota_ch = lax.broadcasted_iota(jnp.int32, (1, ch, 1), 1)

        def chunk_sum(c, acc):
            start = pl.multiple_of(c * ch, ch)
            xs = x_ref[:, pl.ds(start, ch), :].astype(jnp.float32)
            if needs_mask:
                # Zero rows beyond the true sequence length (ragged last tile;
                # out-of-bounds block rows hold unspecified padding).
                rows = base + start + iota_ch
                xs = jnp.where(rows < s_total, xs, 0.0)
            return acc + jnp.sum(xs, axis=1)

        acc_ref[...] += lax.fori_loop(
            0, n_chunks, chunk_sum, jnp.zeros((tb, f), jnp.float32),
            unroll=min(n_chunks, 8))

        @pl.when(k == pl.num_programs(1) - 1)
        def _finalize():
            xm = acc_ref[...] * inv_s                              # (tb, F) f32
            # dense1 + (eval-mode dropout == identity) + ReLU.
            # Matmul operands cast to compute_dtype (bf16 MXU fast path);
            # accumulate in f32.
            h = jnp.dot(xm.astype(compute_dtype),
                        w1_ref[...].astype(compute_dtype),
                        preferred_element_type=jnp.float32)        # (tb, H)
            h = jnp.maximum(h + b1_ref[...].astype(jnp.float32), 0.0)
            # dense2 into a lane-dense 128-wide slab (zero-padded columns).
            out = jnp.dot(h.astype(compute_dtype),
                          w2_ref[...].astype(compute_dtype),
                          preferred_element_type=jnp.float32)      # (tb, 128)
            o_ref[...] = (out + b2_ref[...].astype(jnp.float32)).astype(o_ref.dtype)

    return kernel


def _tile_sizes(B, S, F, itemsize, x_budget):
    """Pick (tb, ts) so the double-buffered x block (2*tb*ts*F*itemsize) fits
    x_budget.  Last-two dims of every block stay full-extent or multiples of 8."""
    tb = min(B, max(0, x_budget // (2 * S * F * itemsize)))
    if tb == B or tb >= 8:
        # Preferred: whole sequence per step, tile only the batch.
        if tb < B:
            tb = (tb // 8) * 8                    # sublane-aligned batch tiles
        if B >= 16:
            # v7x megacore: guarantee >= 2 batch-grid steps so both
            # TensorCores get work (1-TC v5e/v6e: no effect, no harm).
            tb = min(tb, pl.cdiv(B, 2))
            if tb < B:
                tb = max(8, (tb // 8) * 8)
        return max(1, min(tb, B)), S
    # Long-sequence fallback: split S across an "arbitrary" grid axis with a
    # VMEM sum accumulator (keeps pipelining, bounds VMEM on v7x's 64 MiB).
    tb = min(B, 8)
    ts = max(8, (x_budget // (2 * tb * F * itemsize)) // 8 * 8)
    return tb, min(ts, S)


def clsdecoder_prepare_params(w1, b1, w2, b2):
    """One-time parameter prep (call at init, NOT per forward step):
    b1 -> (1, H); dense2 zero-padded to a lane-dense 128-wide output slab."""
    F, H = w1.shape
    out_dim = w2.shape[1]
    assert w2.shape[0] == H and b1.shape == (H,) and b2.shape == (out_dim,)
    assert out_dim <= _OUT_PAD
    w2p = jnp.zeros((H, _OUT_PAD), dtype=w2.dtype).at[:, :out_dim].set(w2)
    b2p = jnp.zeros((1, _OUT_PAD), dtype=b2.dtype).at[0, :out_dim].set(b2)
    return dict(w1=w1, b1=b1.reshape(1, H), w2p=w2p, b2p=b2p, out_dim=out_dim)


def clsdecoder_forward(x, params, *, compute_dtype=jnp.bfloat16,
                       x_budget_bytes=None):
    """x: (B, S, F); params from clsdecoder_prepare_params. Returns (B, 2) f32.

    compute_dtype: dtype of the matmul operands (bf16 = MXU fast path; with
    f32 inputs this trades ~1e-3 absolute error for 3-6x fewer MXU passes).
    x_budget_bytes: override of the double-buffered x-tile budget (testing)."""
    w1, b1, w2p, b2p = params["w1"], params["b1"], params["w2p"], params["b2p"]
    out_dim = params["out_dim"]
    B, S, F = x.shape
    H = w1.shape[1]
    assert w1.shape == (F, H)

    x_it = jnp.dtype(x.dtype).itemsize
    # Resident weights/biases, conservatively counted as double-buffered, with
    # their actual itemsizes.
    w_bytes = 2 * ((F * H + H) * jnp.dtype(w1.dtype).itemsize
                   + (H + 1) * _OUT_PAD * jnp.dtype(w2p.dtype).itemsize)

    # Generation-aware budget for the 2x double-buffered x tile
    # (v5e/v6e: 128 MiB VMEM, v7x: 64 MiB per TensorCore).
    try:
        vmem_cap = int(pltpu.get_tpu_info().vmem_capacity_bytes)
    except Exception:
        vmem_cap = 64 << 20                      # conservative (v7x) fallback
    if x_budget_bytes is None:
        x_budget_bytes = max(int(0.65 * vmem_cap) - w_bytes, 2 << 20)

    tb, ts = _tile_sizes(B, S, F, x_it, int(x_budget_bytes))
    nb, ns = pl.cdiv(B, tb), pl.cdiv(S, ts)

    # Explicit VMEM limit: x double-buffer + out double-buffer + weights +
    # accumulator scratch + headroom; clamp to [32 MiB, physical capacity].
    acc_bytes = 8 * pl.cdiv(tb, 8) * 128 * pl.cdiv(F, 128) * 4
    vmem_limit = (2 * tb * ts * F * x_it
                  + 2 * tb * _OUT_PAD * 4
                  + w_bytes
                  + acc_bytes
                  + (4 << 20))
    vmem_limit = min(vmem_cap, max(int(vmem_limit), 32 << 20))

    flops = B * S * F + 2 * B * F * H + 2 * B * H * _OUT_PAD
    bytes_accessed = B * S * F * x_it + w_bytes // 2 + B * _OUT_PAD * 4

    kernel = _make_kernel(S, ts, compute_dtype)

    out_padded = pl.pallas_call(
        kernel,
        out_shape=jax.ShapeDtypeStruct((B, _OUT_PAD), jnp.float32),
        grid=(nb, ns),
        in_specs=[
            pl.BlockSpec((tb, ts, F), lambda i, k: (i, k, 0)),   # x: streamed
            pl.BlockSpec((F, H), lambda i, k: (0, 0)),           # w1: resident
            pl.BlockSpec((1, H), lambda i, k: (0, 0)),           # b1: resident
            pl.BlockSpec((H, _OUT_PAD), lambda i, k: (0, 0)),    # w2 (padded)
            pl.BlockSpec((1, _OUT_PAD), lambda i, k: (0, 0)),    # b2 (padded)
        ],
        out_specs=pl.BlockSpec((tb, _OUT_PAD), lambda i, k: (i, 0)),
        scratch_shapes=[pltpu.VMEM((tb, F), jnp.float32)],       # seq-sum acc
        compiler_params=pltpu.CompilerParams(
            dimension_semantics=("parallel", "arbitrary"),
            vmem_limit_bytes=int(vmem_limit)),
        cost_estimate=pl.CostEstimate(
            flops=int(flops), transcendentals=0,
            bytes_accessed=int(bytes_accessed)),
    )(x, w1, b1, w2p, b2p)

    # Rows >= B of a partial last batch tile hold padded/garbage data; they are
    # sliced off here — never reuse out_padded rows >= B.
    return out_padded[:, :out_dim]


def _reference(x, w1, b1, w2, b2):
    xm = jnp.mean(x, axis=1)
    h = jnp.maximum(xm @ w1 + b1, 0.0)
    return h @ w2 + b2


if __name__ == "__main__":
    # Shapes consistent with the module: num_feature=32, hidden_size=32,
    # dropout in eval mode (identity), 2-class output.
    k0, k1, k2 = jax.random.split(jax.random.PRNGKey(0), 3)

    def make_inputs(key, B, S, F, H, OUT=2):
        kx, kw1, kb1, kw2, kb2 = jax.random.split(key, 5)
        x = jax.random.normal(kx, (B, S, F), dtype=jnp.float32)
        w1 = jax.random.normal(kw1, (F, H), dtype=jnp.float32) * 0.05
        b1 = jax.random.normal(kb1, (H,), dtype=jnp.float32) * 0.05
        w2 = jax.random.normal(kw2, (H, OUT), dtype=jnp.float32) * 0.05
        b2 = jax.random.normal(kb2, (OUT,), dtype=jnp.float32) * 0.05
        return x, (w1, b1, w2, b2)

    # 1) Main path (whole sequence per step), bf16 MXU compute (serving config).
    #    bf16 matmul operands vs a pure-f32 reference -> looser tolerance.
    x, (w1, b1, w2, b2) = make_inputs(k0, B=8, S=8, F=32, H=32)
    params = clsdecoder_prepare_params(w1, b1, w2, b2)
    out = jax.block_until_ready(clsdecoder_forward(x, params))
    ref = _reference(x, w1, b1, w2, b2)
    assert out.shape == (8, 2)
    assert jnp.allclose(out, ref, atol=1e-2, rtol=1e-2), "bf16 path mismatch"

    # 2) Same path, f32 compute, tight tolerance.
    out32 = jax.block_until_ready(
        clsdecoder_forward(x, params, compute_dtype=jnp.float32))
    assert jnp.allclose(out32, ref, atol=1e-5, rtol=1e-5), "f32 path mismatch"

    # 3) Sequence-split path (forced tiny x budget -> ns > 1): accumulator +
    #    pl.when finalize; sequence divisible by the tile.
    x3, (w1, b1, w2, b2) = make_inputs(k1, B=4, S=24, F=32, H=32)
    p3 = clsdecoder_prepare_params(w1, b1, w2, b2)
    out3 = jax.block_until_ready(
        clsdecoder_forward(x3, p3, compute_dtype=jnp.float32,
                           x_budget_bytes=8 * 1024))
    assert jnp.allclose(out3, _reference(x3, w1, b1, w2, b2),
                        atol=1e-5, rtol=1e-5), "seq-split path mismatch"

    # 4) Sequence-split path with a ragged (masked) last sequence tile.
    x4, (w1, b1, w2, b2) = make_inputs(k2, B=4, S=20, F=32, H=32)
    p4 = clsdecoder_prepare_params(w1, b1, w2, b2)
    out4 = jax.block_until_ready(
        clsdecoder_forward(x4, p4, compute_dtype=jnp.float32,
                           x_budget_bytes=8 * 1024))
    assert jnp.allclose(out4, _reference(x4, w1, b1, w2, b2),
                        atol=1e-5, rtol=1e-5), "masked seq-split mismatch"

    print("KERNEL_OK")
</pallas_src>

<mosaic_0001>
module attributes {stable_mosaic.version = 11 : i64} {
  func.func @kernel(%arg0: i32, %arg1: i32, %arg2: memref<8x8x32xf32, #tpu.memory_space<vmem>>, %arg3: memref<32x32xf32, #tpu.memory_space<vmem>>, %arg4: memref<1x32xf32, #tpu.memory_space<vmem>>, %arg5: memref<32x128xf32, #tpu.memory_space<vmem>>, %arg6: memref<1x128xf32, #tpu.memory_space<vmem>>, %arg7: memref<8x128xf32, #tpu.memory_space<vmem>>, %arg8: memref<8x32xf32, #tpu.memory_space<vmem>>) attributes {dimension_semantics = [#tpu.dimension_semantics<parallel>, #tpu.dimension_semantics<arbitrary>], iteration_bounds = array<i64: 1, 1>, scalar_prefetch = 0 : i64, scratch_operands = 1 : i64, tpu.core_type = #tpu.core_type<tc>, window_params = [{transform_indices = @transform_0, window_bounds = array<i64: 8, 8, 32>}, {pipeline_mode = #tpu.pipeline_mode<synchronous>, transform_indices = @transform_1, window_bounds = array<i64: 32, 32>}, {pipeline_mode = #tpu.pipeline_mode<synchronous>, transform_indices = @transform_2, window_bounds = array<i64: 1, 32>}, {pipeline_mode = #tpu.pipeline_mode<synchronous>, transform_indices = @transform_3, window_bounds = array<i64: 32, 128>}, {pipeline_mode = #tpu.pipeline_mode<synchronous>, transform_indices = @transform_4, window_bounds = array<i64: 1, 128>}, {transform_indices = @transform_5, window_bounds = array<i64: 8, 128>}]} {
    %c0_i32 = arith.constant 0 : i32
    %0 = arith.cmpi eq, %arg1, %c0_i32 : i32
    %1 = arith.extui %0 : i1 to i32
    %c0_i32_0 = arith.constant 0 : i32
    %2 = arith.cmpi ne, %1, %c0_i32_0 : i32
    scf.if %2 {
      %cst_10 = arith.constant 0.000000e+00 : f32
      %16 = vector.broadcast %cst_10 : f32 to vector<8x32xf32>
      %c0_11 = arith.constant 0 : index
      %c0_12 = arith.constant 0 : index
      %17 = vector.load %arg8[%c0_11, %c0_12] : memref<8x32xf32, #tpu.memory_space<vmem>>, vector<8x32xf32>
      tpu.vector_store %arg8[%c0_11, %c0_12], %16 {strides = array<i32>} : memref<8x32xf32, #tpu.memory_space<vmem>>, vector<8x32xf32>,
    } else {
    }
    %c0 = arith.constant 0 : index
    %c0_1 = arith.constant 0 : index
    %3 = vector.load %arg8[%c0, %c0_1] : memref<8x32xf32, #tpu.memory_space<vmem>>, vector<8x32xf32>
    %cst = arith.constant 0.000000e+00 : f32
    %4 = vector.broadcast %cst : f32 to vector<8x32xf32>
    %c0_i32_2 = arith.constant 0 : i32
    %c8_i32 = arith.constant 8 : i32
    %5 = arith.muli %c0_i32_2, %c8_i32 : i32
    %6 = tpu.assume_multiple %5, 8 : i32
    %c0_3 = arith.constant 0 : index
    %7 = arith.index_cast %6 : i32 to index
    %c0_4 = arith.constant 0 : index
    %8 = vector.load %arg2[%c0_3, %7, %c0_4] : memref<8x8x32xf32, #tpu.memory_space<vmem>>, vector<8x8x32xf32>
    %cst_5 = arith.constant dense<0.000000e+00> : vector<8x32xf32>
    %9 = vector.multi_reduction <add>, %8, %cst_5 [1] : vector<8x8x32xf32> to vector<8x32xf32>
    %10 = arith.addf %4, %9 : vector<8x32xf32>
    %c1_i32 = arith.constant 1 : i32
    %11 = arith.addf %3, %10 : vector<8x32xf32>
    %c0_6 = arith.constant 0 : index
    %c0_7 = arith.constant 0 : index
    %12 = vector.load %arg8[%c0_6, %c0_7] : memref<8x32xf32, #tpu.memory_space<vmem>>, vector<8x32xf32>
    tpu.vector_store %arg8[%c0_6, %c0_7], %11 {strides = array<i32>} : memref<8x32xf32, #tpu.memory_space<vmem>>, vector<8x32xf32>,
    %c0_i32_8 = arith.constant 0 : i32
    %13 = arith.cmpi eq, %arg1, %c0_i32_8 : i32
    %14 = arith.extui %13 : i1 to i32
    %c0_i32_9 = arith.constant 0 : i32
    %15 = arith.cmpi ne, %14, %c0_i32_9 : i32
    scf.if %15 {
      %c0_10 = arith.constant 0 : index
      %c0_11 = arith.constant 0 : index
      %16 = vector.load %arg8[%c0_10, %c0_11] : memref<8x32xf32, #tpu.memory_space<vmem>>, vector<8x32xf32>
      %cst_12 = arith.constant 1.250000e-01 : f32
      %17 = vector.broadcast %cst_12 : f32 to vector<8x32xf32>
      %18 = arith.mulf %16, %17 : vector<8x32xf32>
      %19 = arith.truncf %18 : vector<8x32xf32> to vector<8x32xbf16>
      %c0_13 = arith.constant 0 : index
      %c0_14 = arith.constant 0 : index
      %20 = vector.load %arg3[%c0_13, %c0_14] : memref<32x32xf32, #tpu.memory_space<vmem>>, vector<32x32xf32>
      %21 = arith.truncf %20 : vector<32x32xf32> to vector<32x32xbf16>
      %cst_15 = arith.constant dense<0.000000e+00> : vector<8x32xf32>
      %22 = tpu.matmul %19, %21, %cst_15 {dimension_numbers = #tpu.dot_dimension_numbers<[1], [0], [0], [1], [0, 0, 1, 1], [], []>} : vector<8x32xbf16>, vector<32x32xbf16>, vector<8x32xf32> -> vector<8x32xf32>
      %c0_16 = arith.constant 0 : index
      %c0_17 = arith.constant 0 : index
      %23 = vector.load %arg4[%c0_16, %c0_17] : memref<1x32xf32, #tpu.memory_space<vmem>>, vector<1x32xf32>
      %24 = vector.broadcast %23 : vector<1x32xf32> to vector<8x32xf32>
      %25 = arith.addf %22, %24 : vector<8x32xf32>
      %cst_18 = arith.constant 0.000000e+00 : f32
      %26 = vector.broadcast %cst_18 : f32 to vector<8x32xf32>
      %27 = arith.maximumf %25, %26 : vector<8x32xf32>
      %28 = arith.truncf %27 : vector<8x32xf32> to vector<8x32xbf16>
      %c0_19 = arith.constant 0 : index
      %c0_20 = arith.constant 0 : index
      %29 = vector.load %arg5[%c0_19, %c0_20] : memref<32x128xf32, #tpu.memory_space<vmem>>, vector<32x128xf32>
      %30 = arith.truncf %29 : vector<32x128xf32> to vector<32x128xbf16>
      %cst_21 = arith.constant dense<0.000000e+00> : vector<8x128xf32>
      %31 = tpu.matmul %28, %30, %cst_21 {dimension_numbers = #tpu.dot_dimension_numbers<[1], [0], [0], [1], [0, 0, 1, 1], [], []>} : vector<8x32xbf16>, vector<32x128xbf16>, vector<8x128xf32> -> vector<8x128xf32>
      %c0_22 = arith.constant 0 : index
      %c0_23 = arith.constant 0 : index
      %32 = vector.load %arg6[%c0_22, %c0_23] : memref<1x128xf32, #tpu.memory_space<vmem>>, vector<1x128xf32>
      %33 = vector.broadcast %32 : vector<1x128xf32> to vector<8x128xf32>
      %34 = arith.addf %31, %33 : vector<8x128xf32>
      %c0_24 = arith.constant 0 : index
      %c0_25 = arith.constant 0 : index
      %35 = vector.load %arg7[%c0_24, %c0_25] : memref<8x128xf32, #tpu.memory_space<vmem>>, vector<8x128xf32>
      tpu.vector_store %arg7[%c0_24, %c0_25], %34 {strides = array<i32>} : memref<8x128xf32, #tpu.memory_space<vmem>>, vector<8x128xf32>,
    } else {
    }
    return
  }
  func.func @transform_0(%arg0: i32, %arg1: i32) -> (i32, i32, i32) {
    %c0_i32 = arith.constant 0 : i32
    %c0_i32_0 = arith.constant 0 : i32
    return %arg0, %arg1, %c0_i32 : i32, i32, i32
  }
  func.func @transform_1(%arg0: i32, %arg1: i32) -> (i32, i32) {
    %c0_i32 = arith.constant 0 : i32
    %c0_i32_0 = arith.constant 0 : i32
    %c0_i32_1 = arith.constant 0 : i32
    return %c0_i32, %c0_i32_0 : i32, i32
  }
  func.func @transform_2(%arg0: i32, %arg1: i32) -> (i32, i32) {
    %c0_i32 = arith.constant 0 : i32
    %c0_i32_0 = arith.constant 0 : i32
    %c0_i32_1 = arith.constant 0 : i32
    return %c0_i32, %c0_i32_0 : i32, i32
  }
  func.func @transform_3(%arg0: i32, %arg1: i32) -> (i32, i32) {
    %c0_i32 = arith.constant 0 : i32
    %c0_i32_0 = arith.constant 0 : i32
    %c0_i32_1 = arith.constant 0 : i32
    return %c0_i32, %c0_i32_0 : i32, i32
  }
  func.func @transform_4(%arg0: i32, %arg1: i32) -> (i32, i32) {
    %c0_i32 = arith.constant 0 : i32
    %c0_i32_0 = arith.constant 0 : i32
    %c0_i32_1 = arith.constant 0 : i32
    return %c0_i32, %c0_i32_0 : i32, i32
  }
  func.func @transform_5(%arg0: i32, %arg1: i32) -> (i32, i32) {
    %c0_i32 = arith.constant 0 : i32
    %c0_i32_0 = arith.constant 0 : i32
    return %arg0, %c0_i32 : i32, i32
  }
}

</mosaic_0001>

<bundles_post_ra>
// kernel: tpu_custom_call.1
= control target key start
LH: loop header
LB: loop body
LE: loop exit
PB: predicated region body
PF: predicated region fallthrough
CT: control target
= control target key end

     0   :  { %10 = vsyncpa [#allocation4], 0  ;;  %s562_s0 = inlined_call_operand.hbm [shape: f32[8,8,32], index: 0, kind: input, shape index: {}]   ;;  %s563_s1 = inlined_call_operand.hbm [shape: f32[32,32], index: 1, kind: input, shape index: {}]   ;;  %s564_s2 = inlined_call_operand.vmem [shape: f32[1,32], index: 2, kind: input, shape index: {}]   ;;  %s565_s3 = inlined_call_operand.hbm [shape: f32[32,128], index: 3, kind: input, shape index: {}]   ;;  %s566_s4 = inlined_call_operand.vmem [shape: f32[1,128], index: 4, kind: input, shape index: {}]   ;;  %s567_s5 = inlined_call_operand.hbm [shape: f32[8,128], index: 5, kind: output, shape index: {}]  }
   0x1   :  { %11 = vsyncpa [#allocation7], 0 }
   0x2   :  { %12 = vsyncpa [#allocation5], 0  ;;  %s433_s18 = smov [#allocation6]   ;;  %s434_s20 = smov [#allocation3]  }
   0x3   :  { %s30_s19 = sshll.u32 %s433_s18, 4  ;;  %s18_s21 = sshll.u32 %s434_s20, 4  ;;  %s31_s19 = int_to_ptr.vmem [resolvable:$true] %s30_s19  ;;  %s471_s21 = int_to_ptr.vmem [resolvable:$true] %s18_s21 }
   0x4   :  { %s339_s24 = scalar_lea.hbm %s563_s1, 512 }
   0x5   :  { %p340_p0 = scmp.ne.s32.totalorder %s563_s1, %s339_s24  ;;  %p343_p1 = scmp.lt.u32.totalorder %s339_s24, %s563_s1 }
   0x7   :  { %p345_p2 = pnand %p343_p1, %p340_p0 }
   0x9   :  { %348 = shalt.err (!%p345_p2)
}
   0xa   :  { %s349_s29 = scalar_lea.vmem %s31_s19, 512  ;;  %p354_p4 = scmp.lt.s32.totalorder %s31_s19, %s31_s19 }
   0xb   :  { %p350_p3 = scmp.ne.s32.totalorder %s31_s19, %s349_s29  ;;  %p355_p5 = scmp.lt.s32.totalorder %s349_s29, %s349_s29 }
   0xd   :  { %p356_p6 = por %p355_p5, %p354_p4 }
   0xf   :  { %p357_p7 = pnand %p356_p6, %p350_p3 }
  0x11   :  { %360 = shalt.err (!%p357_p7)
}
  0x12   :  { %s435_s30 = smov 128   ;;  %s436_s6 = smov 8  }
  0x13   :  { %36 = dma.hbm_to_vmem [thread:$0]  %s563_s1, 512, %s31_s19, [#allocation7], %s435_s30, %s435_s30, %s436_s6  }
  0x14   :  { %s361_s11 = scalar_lea.hbm %s562_s0, 1024 }
  0x15   :  { %p362_p8 = scmp.ne.s32.totalorder %s562_s0, %s361_s11  ;;  %p365_p9 = scmp.lt.u32.totalorder %s361_s11, %s562_s0 }
  0x17   :  { %p367_p10 = pnand %p365_p9, %p362_p8 }
  0x19   :  { %370 = shalt.err (!%p367_p10)
}
  0x1a   :  { %s371_s16 = scalar_lea.vmem %s471_s21, 1024  ;;  %p376_p12 = scmp.lt.s32.totalorder %s471_s21, %s471_s21 }
  0x1b   :  { %p372_p11 = scmp.ne.s32.totalorder %s471_s21, %s371_s16  ;;  %p377_p13 = scmp.lt.s32.totalorder %s371_s16, %s371_s16 }
  0x1d   :  { %p378_p0 = por %p377_p13, %p376_p12 }
  0x1f   :  { %p379_p1 = pnand %p378_p0, %p372_p11 }
  0x21   :  { %382 = shalt.err (!%p379_p1)
}
  0x22   :  { %24 = dma.hbm_to_vmem [thread:$0]  %s562_s0, 1024, %s471_s21, [#allocation4], %s435_s30, %s435_s30, %s436_s6  }
  0x23   :  { %s437_s18 = smov [#allocation8]   ;;  %s383_s23 = scalar_lea.hbm %s565_s3, 512 }
  0x24   :  { %s44_s19 = sshll.u32 %s437_s18, 4  ;;  %p384_p2 = scmp.ne.s32.totalorder %s565_s3, %s383_s23  ;;  %s45_s19 = int_to_ptr.vmem [resolvable:$true] %s44_s19 }
  0x25   :  { %p387_p3 = scmp.lt.u32.totalorder %s383_s23, %s565_s3 }
  0x27   :  { %p389_p4 = pnand %p387_p3, %p384_p2 }
  0x29   :  { %392 = shalt.err (!%p389_p4)
}
  0x2a   :  { %s393_s28 = scalar_lea.vmem %s45_s19, 512  ;;  %p398_p6 = scmp.lt.s32.totalorder %s45_s19, %s45_s19 }
  0x2b   :  { %p394_p5 = scmp.ne.s32.totalorder %s45_s19, %s393_s28  ;;  %p399_p7 = scmp.lt.s32.totalorder %s393_s28, %s393_s28 }
  0x2d   :  { %p400_p8 = por %p399_p7, %p398_p6 }
  0x2f   :  { %p401_p9 = pnand %p400_p8, %p394_p5 }
  0x31   :  { %404 = shalt.err (!%p401_p9)
}
  0x32   :  { %50 = dma.hbm_to_vmem [thread:$0]  %s565_s3, 512, %s45_s19, [#allocation7], %s435_s30, %s435_s30, %s436_s6  }
  0x33   :  { %427 = dma.done.wait [#allocation4], 1024  }
  0x34   :  { %428 = vsyncadd [#allocation4], 4294966272 }
  0x35   :  { %429 = dma.done.wait [#allocation7], 1024  }
  0x36   :  { %430 = vsyncadd [#allocation7], 4294966272  ;;  %vm67_vm0 = vcmask 261120   ;;  %v438_v0 = vmov 0.0   ;;  %vm439_vm1 = vmmov 0   ;;  %v70_v1 = vld [vmem:[#allocation3] sm:$0xff] }
  0x37   :  { %68 = vst.msk [vmem:[#allocation2] sm:$0xff] %vm67_vm0, %v438_v0  ;;  %315 = vmatprep.subr.bf16.mxu0 %v438_v0  ;;  %323 = vmatprep.subr.bf16.mxu1 %v438_v0  ;;  %v71_v2 = vld [vmem:[#allocation3 + $0x8] sm:$0xff]  ;;  %v72_v3 = vld [vmem:[#allocation3 + $0x10] sm:$0xff]  ;;  %v73_v4 = vld [vmem:[#allocation3 + $0x18] sm:$0xff]  ;;  %v79_v6 = vsel %vm67_vm0, %v70_v1, 0.0  ;;  %vm151_vm2 = vcmask 1041409  }
  0x38   :  { %319 = vmatprep.mubr.msk.bf16.mxu0 %vm439_vm1, %v438_v0  ;;  %327 = vmatprep.mubr.msk.bf16.mxu1 %vm439_vm1, %v438_v0  ;;  %v74_v5 = vld [vmem:[#allocation3 + $0x20] sm:$0xff]  ;;  %v86_v7 = vsel %vm67_vm0, %v71_v2, 0.0  ;;  %v93_v8 = vsel %vm67_vm0, %v72_v3, 0.0  ;;  %v75_v9 = vld [vmem:[#allocation3 + $0x28] sm:$0xff]  ;;  %v76_v10 = vld [vmem:[#allocation3 + $0x30] sm:$0xff]  ;;  %v80_v12 = vrot.slane %v79_v6, 4 }
  0x39   :  { %v77_v11 = vld [vmem:[#allocation3 + $0x38] sm:$0xff]  ;;  %v87_v13 = vrot.slane %v86_v7, 4  ;;  %v94_v14 = vrot.slane %v93_v8, 4  ;;  %v100_v15 = vsel %vm67_vm0, %v73_v4, 0.0  ;;  %v107_v16 = vsel %vm67_vm0, %v74_v5, 0.0  ;;  %v174_v51 = vld [vmem:[#allocation6] sm:$0xff] }
  0x3a   :  { %v114_v17 = vsel %vm67_vm0, %v75_v9, 0.0  ;;  %v121_v18 = vsel %vm67_vm0, %v76_v10, 0.0  ;;  %v81_v19 = vadd.f32 %v80_v12, %v79_v6  ;;  %v101_v22 = vrot.slane %v100_v15, 4  ;;  %v175_v52 = vld [vmem:[#allocation6 + $0x8] sm:$0xff]  ;;  %v176_v61 = vld [vmem:[#allocation6 + $0x10] sm:$0xff]  ;;  %v177_v62 = vld [vmem:[#allocation6 + $0x18] sm:$0xff] }
  0x3b   :  { %v88_v20 = vadd.f32 %v87_v13, %v86_v7  ;;  %v95_v21 = vadd.f32 %v94_v14, %v93_v8  ;;  %v108_v23 = vrot.slane %v107_v16, 4  ;;  %v115_v24 = vrot.slane %v114_v17, 4  ;;  %s440_s7 = smov [#allocation9]  }
  0x3c   :  { %v122_v25 = vrot.slane %v121_v18, 4  ;;  %v128_v26 = vsel %vm67_vm0, %v77_v11, 0.0  ;;  %vm153_vm3 = vcmask 1042434   ;;  %v82_v27 = vrot.slane %v81_v19, 2  ;;  %s295_s8 = sshll.u32 %s440_s7, 4  ;;  %s296_s8 = int_to_ptr.vmem [resolvable:$true] %s295_s8 }
  0x3d   :  { %v89_v28 = vrot.slane %v88_v20, 2  ;;  %v96_v29 = vrot.slane %v95_v21, 2  ;;  %v102_v30 = vadd.f32 %v101_v22, %v100_v15  ;;  %v109_v31 = vadd.f32 %v108_v23, %v107_v16  ;;  %v234_v23 = vld [vmem:[#allocation8 + $0x10] sm:$0xff]  ;;  %p410_p11 = scmp.lt.s32.totalorder %s296_s8, %s296_s8 }
  0x3e   :  { %v116_v32 = vadd.f32 %v115_v24, %v114_v17  ;;  %v123_v33 = vadd.f32 %v122_v25, %v121_v18  ;;  %v129_v34 = vrot.slane %v128_v26, 4  ;;  %v83_v35 = vadd.f32 %v82_v27, %v81_v19  ;;  %v69_v12 = vld [vmem:[#allocation2] sm:$0xff] }
  0x3f   :  { %v90_v36 = vadd.f32 %v89_v28, %v88_v20  ;;  %v97_v37 = vadd.f32 %v96_v29, %v95_v21  ;;  %v103_v38 = vrot.slane %v102_v30, 2  ;;  %v110_v39 = vrot.slane %v109_v31, 2  ;;  %v232_v20 = vld [vmem:[#allocation8] sm:$0xff]  ;;  %v233_v21 = vld [vmem:[#allocation8 + $0x8] sm:$0xff]  ;;  %v235_v24 = vld [vmem:[#allocation8 + $0x18] sm:$0xff] }
  0x40   :  { %v117_v40 = vrot.slane %v116_v32, 2  ;;  %v124_v41 = vrot.slane %v123_v33, 2  ;;  %v130_v42 = vadd.f32 %v129_v34, %v128_v26  ;;  %v84_v43 = vrot.slane %v83_v35, 1  ;;  %v305_v26 = vld [vmem:[%s564_s2] ss:$0 sm:$0xff]  ;;  %s405_s2 = scalar_lea.vmem %s296_s8, 128 }
  0x41   :  { %v91_v44 = vrot.slane %v90_v36, 1  ;;  %v98_v45 = vrot.slane %v97_v37, 1  ;;  %v104_v46 = vadd.f32 %v103_v38, %v102_v30  ;;  %v111_v47 = vadd.f32 %v110_v39, %v109_v31  ;;  %p406_p10 = scmp.ne.s32.totalorder %s296_s8, %s405_s2  ;;  %p411_p12 = scmp.lt.s32.totalorder %s405_s2, %s405_s2 }
  0x42   :  { %v118_v48 = vadd.f32 %v117_v40, %v116_v32  ;;  %v125_v49 = vadd.f32 %v124_v41, %v123_v33  ;;  %v131_v50 = vrot.slane %v130_v42, 2  ;;  %v85_v53 = vadd.f32 %v84_v43, %v83_v35 }
  0x43   :  { %v92_v54 = vadd.f32 %v91_v44, %v90_v36  ;;  %v99_v55 = vadd.f32 %v98_v45, %v97_v37  ;;  %v105_v56 = vrot.slane %v104_v46, 1  ;;  %v112_v57 = vrot.slane %v111_v47, 1  ;;  %p412_p13 = por %p411_p12, %p410_p11 }
  0x44   :  { %v119_v58 = vrot.slane %v118_v48, 1  ;;  %v126_v59 = vrot.slane %v125_v49, 1  ;;  %v132_v60 = vadd.f32 %v131_v50, %v130_v42  ;;  %vm155_vm4 = vcmask 1043459  }
  0x45   :  { %v106_v63 = vadd.f32 %v105_v56, %v104_v46  ;;  %v152_v1 = vsel %vm151_vm2, %v92_v54, %v85_v53  ;;  %v178_v2 = vpack.c.bf16 %v175_v52, %v174_v51  ;;  %v113_v3 = vadd.f32 %v112_v57, %v111_v47  ;;  %p413_p0 = pnand %p412_p13, %p406_p10 }
  0x46   :  { %v120_v4 = vadd.f32 %v119_v58, %v118_v48  ;;  %v133_v5 = vrot.slane %v132_v60, 1  ;;  %vm157_vm5 = vcmask 1044484   ;;  %v127_v6 = vadd.f32 %v126_v59, %v125_v49 }
  0x47   :  { %v154_v7 = vsel %vm153_vm3, %v99_v55, %v152_v1  ;;  %vm159_vm6 = vcmask 1045509   ;;  %316 = vmatpush3.bf16.msra.mxu0 %v178_v2  ;;  %v179_v8 = vpack.c.bf16 %v177_v62, %v176_v61  ;;  %vm161_vm7 = vcmask 1046534  }
  0x48   :  { %v134_v9 = vadd.f32 %v133_v5, %v132_v60  ;;  %v156_v10 = vsel %vm155_vm4, %v106_v63, %v154_v7  ;;  %317 = vmatprep.subr.bf16.mxu0 %v438_v0  ;;  %vm163_vm8 = vcmask 1047559   ;;  %v236_v22 = vpack.c.bf16 %v233_v21, %v232_v20 }
  0x49   :  { %v158_v11 = vsel %vm157_vm5, %v113_v3, %v156_v10  ;;  %v237_v25 = vpack.c.bf16 %v235_v24, %v234_v23 }
  0x4a   :  { %v160_v13 = vsel %vm159_vm6, %v120_v4, %v158_v11  ;;  %324 = vmatpush3.bf16.msra.mxu1 %v236_v22 }
  0x4b   :  { %v162_v14 = vsel %vm161_vm7, %v127_v6, %v160_v13  ;;  %318 = vmatpush3.bf16.msra.mxu0 %v179_v8  ;;  %325 = vmatprep.subr.bf16.mxu1 %v438_v0  ;;  %v307_v0 = vld [vmem:[%s566_s4] ss:$0 sm:$0xff] }
  0x4c   :  { %v164_v15 = vsel %vm163_vm8, %v134_v9, %v162_v14 }
  0x4d   :  { %v166_v16 = vadd.f32 %v164_v15, %v69_v12 }
  0x4e   :  { %326 = vmatpush3.bf16.msra.mxu1 %v237_v25 }
  0x4f   :  { %167 = vst.msk [vmem:[#allocation2] sm:$0xff] %vm67_vm0, %v166_v16 }
  0x56   :  { %v171_v17 = vld [vmem:[#allocation2] sm:$0xff] }
  0x57   :  { %v172_v18 = vmul.f32 0.125, %v171_v17 }
  0x59   :  { %v173_v19 = vpack.c.bf16 %v172_v18, %v172_v18 }
  0x5b   :  { %320 = vmatmul.mubr.msk.bf16.vlgmr.msra.gmra.mrb[0].mxu0 %vm67_vm0, %v173_v19 }
 0x12e   :  { %v224_v27 = vpop.f32.mrb[0].mxu0 }
 0x12f   :  { %v225_v28 = vadd.f32 %v305_v26, %v224_v27  ;;  %v321_v29 = vpop.f32.mrb[1].mxu0 }
 0x130   :  { %v227_v30 = vpop.f32.mrb[2].mxu0 }
 0x131   :  { %v230_v31 = vmax.f32 %v225_v28, 0.0  ;;  %v322_v32 = vpop.f32.mrb[3].mxu0 }
 0x133   :  { %v231_v33 = vpack.c.bf16 %v230_v31, %v230_v31 }
 0x135   :  { %328 = vmatmul.mubr.msk.bf16.vlgmr.msra.gmra.mrb[0].mxu1 %vm67_vm0, %v231_v33 }
 0x208   :  { %v282_v34 = vpop.f32.mrb[0].mxu1 }
 0x209   :  { %v283_v35 = vadd.f32 %v307_v0, %v282_v34  ;;  %v329_v36 = vpop.f32.mrb[1].mxu1 }
 0x20a   :  { %v285_v37 = vpop.f32.mrb[2].mxu1 }
 0x20b   :  { %288 = vst [vmem:[#allocation9] sm:$0xff] %v283_v35  ;;  %v330_v38 = vpop.f32.mrb[3].mxu1 }
 0x20c   :  { %416 = shalt.err (!%p413_p0)
}
 0x20d   :  { %s417_s4 = scalar_lea.hbm %s567_s5, 128 }
 0x20e   :  { %p418_p1 = scmp.ne.s32.totalorder %s567_s5, %s417_s4  ;;  %p421_p2 = scmp.lt.u32.totalorder %s417_s4, %s567_s5 }
 0x210   :  { %p423_p3 = pnand %p421_p2, %p418_p1 }
 0x212   :  { %426 = shalt.err (!%p423_p3)
}
 0x213   :  { %298 = dma.vmem_to_hbm [thread:$0]  %s296_s8, 128, %s567_s5, [#allocation5]  }
 0x214   :  { %431 = dma.done.wait [#allocation5], 128  }
 0x215   :  { %432 = vsyncadd [#allocation5], 4294967168 }
 0x216   :  { %302 = vsyncpa [#allocation4], 1 }
 0x217   :  { %303 = vsyncpa [#allocation7], 1 }
 0x218   :  { %304 = vsyncpa [#allocation5], 1 }

</bundles_post_ra>
